<compile_context>
chip_gen: v5e
topology: v5e:2x2
jax: 0.10.0
libtpu: 0.0.40
codegen_flags: <defaults>
</compile_context>

<pallas_src>
import jax
import jax.numpy as jnp
from jax import lax
from jax.experimental import pallas as pl
from jax.experimental.pallas import tpu as pltpu


# ---------------------------------------------------------------------------
# Generation-aware budgets.
# ---------------------------------------------------------------------------

def _vmem_limit_bytes():
    """~75% of physical VMEM: 96 MiB on v5e/v6e (128 MiB parts), 48 MiB on v7x."""
    cap = 64 * 1024 * 1024
    try:
        info = pltpu.get_tpu_info()
        cap = int(getattr(info, "vmem_capacity_bytes", cap)) or cap
    except Exception:
        pass
    return max(32 * 1024 * 1024, (cap * 3) // 4)


_CHUNK_LANES = 2048          # compute-chunk width: bounds the (E, chunk) intermediate


def _pick_chunk(total, requested=None, target=_CHUNK_LANES):
    """Compute-chunk width: a multiple-of-128 divisor of `total` <= target,
    falling back to `total` itself (no inner chunking) when none exists."""
    if requested is not None and total % requested == 0 and (
            requested % 128 == 0 or requested == total):
        return requested
    if total <= target:
        return total
    c = (target // 128) * 128
    while c >= 128 and total % c != 0:
        c -= 128
    return c if c >= 128 else total


def _pick_tile(n, target_lanes):
    """Spatial tile for the two-pass path: a multiple of 128, preferring an
    exact divisor of N (no padding copy); otherwise N is padded up to a
    multiple of the tile and the padded lanes are masked inside the kernel."""
    target = max(128, (min(n, target_lanes) // 128) * 128)
    if n % 128 == 0:
        t = target
        while t >= 128 and n % t != 0:
            t -= 128
        if t >= max(128, target // 8):
            return t, n, False
    n_pad = -(-n // target) * target
    return target, n_pad, True


def _two_pass_tile_lanes(C, vmem_limit):
    # Per-step VMEM per lane of the tile: x + attn double-buffered + tau blocks.
    per_lane = 4 * (2 * C + 2 * C + 2)
    step_budget = min(vmem_limit // 3, 24 * 1024 * 1024)
    return max(128, ((step_budget // per_lane) // 128) * 128)


def _single_pass_vmem_bytes(C, E, N, chunk):
    io = 2 * (4 * C * N) + 2 * (4 * C * N) + 2 * (4 * N)   # x, attn (2-buf), tau
    scratch = 4 * N                                        # score scratch
    inter = 4 * 4 * E * chunk                              # live (E,chunk) temporaries
    return io + scratch + inter + (2 << 20)                # + slack


# ---------------------------------------------------------------------------
# Per-chunk score pipeline (shared by both paths).
# ---------------------------------------------------------------------------

def _chunk_scores(xc, w1, b1, w2_row, ones_row):
    """Attention logits for a (C, T) chunk of pixels -> (1, T).

    Matches  w2 . relu(F.normalize(w1 @ x + b1, dim=channels))  per pixel:
      * the L2-normalisation factor r = 1/max(||t||, 1e-12) is > 0, so
        relu(r*t) == r*relu(t); hoisting r past the relu / w2 reduction removes
        the (E,T)-wide broadcast multiply (VALU is the binding unit).
      * both channel reductions run as (1,E)@(E,T) matmuls on the mostly-idle
        MXU instead of VPU/XLU sublane reduces.
      * 1/max(sqrt(ss), 1e-12) == rsqrt(max(ss, 1e-24))  (single EUP op).
    """
    t = jnp.dot(w1, xc, preferred_element_type=jnp.float32) + b1        # (E, T)
    u = jnp.maximum(t, 0.0)                                             # relu(t)
    num = jnp.dot(w2_row, u, preferred_element_type=jnp.float32)        # (1, T)
    ss = jnp.dot(ones_row, t * t, preferred_element_type=jnp.float32)   # (1, T)
    return num * lax.rsqrt(jnp.maximum(ss, 1e-24))                      # (1, T)


# ---------------------------------------------------------------------------
# Single-pass kernel: one batch element's (C, N) slab is resident in VMEM.
# ---------------------------------------------------------------------------

def _make_single_pass_kernel(*, n, chunk):
    n_chunks = n // chunk
    aligned = (chunk % 128 == 0)

    def kernel(x_ref, w1_ref, b1_ref, w2_ref, attn_ref, tau_ref, s_ref):
        w1 = w1_ref[...]
        b1 = b1_ref[...]
        w2_row = w2_ref[...]
        ones_row = jnp.ones_like(w2_row)
        x_v = x_ref.at[0]                                   # (C, N) view

        def chunk_body(ci):
            start = ci * chunk
            if n_chunks > 1 and aligned:
                start = pl.multiple_of(start, 128)
            xc = x_v[:, pl.ds(start, chunk)]
            s_ref[:, pl.ds(start, chunk)] = _chunk_scores(xc, w1, b1, w2_row, ones_row)

        # Compute chunk keeps the (E, chunk) intermediate small so the slab
        # size (not the 8x-expanded tensor) sets the VMEM working set.
        if n_chunks == 1:
            chunk_body(0)
        else:
            pl.loop(0, n_chunks)(chunk_body)

        s = s_ref[...]                                       # (1, N)
        m = jnp.max(s, axis=-1, keepdims=True)
        e = jnp.exp(s - m)
        tau = e * pl.reciprocal(jnp.sum(e, axis=-1, keepdims=True), approx=False)
        attn_ref[0] = x_ref[0] * tau                         # (C, N)
        tau_ref[0] = tau                                     # (1, N)

    return kernel


# ---------------------------------------------------------------------------
# Two-pass tiled kernel (online softmax) for N that doesn't fit single-pass.
# ---------------------------------------------------------------------------

def _make_two_pass_kernel(*, tile_n, chunk, n_true, cache_scores, needs_mask):
    assert tile_n % 128 == 0 and chunk % 128 == 0 and tile_n % chunk == 0
    n_chunks = tile_n // chunk
    neg_inf = float("-inf")

    def masked(s, n, start):
        if not needs_mask:
            return s
        lane = lax.broadcasted_iota(jnp.int32, s.shape, 1)
        return jnp.where(n * tile_n + start + lane < n_true, s, neg_inf)

    def kernel(x_ref, w1_ref, b1_ref, w2_ref, attn_ref, tau_ref,
               m_ref, l_ref, cache_ref):
        p = pl.program_id(1)        # 0: score / softmax-stat pass, 1: output pass
        n = pl.program_id(2)        # spatial tile index
        last_tile = pl.num_programs(2) - 1

        w1 = w1_ref[...]
        b1 = b1_ref[...]
        w2_row = w2_ref[...]
        ones_row = jnp.ones_like(w2_row)
        x_v = x_ref.at[0]           # (C, tile_n) view
        a_v = attn_ref.at[0]        # (C, tile_n) view
        t_v = tau_ref.at[0]         # (1, tile_n) view

        @pl.when(jnp.logical_and(p == 0, n == 0))
        def _():
            m_ref[...] = jnp.full((1, 1), neg_inf, jnp.float32)
            l_ref[...] = jnp.zeros((1, 1), jnp.float32)

        @pl.when(p == 0)
        def _():
            def chunk_body(ci):
                start = ci * chunk
                if n_chunks > 1:
                    start = pl.multiple_of(start, 128)
                xc = x_v[:, pl.ds(start, chunk)]
                s = masked(_chunk_scores(xc, w1, b1, w2_row, ones_row), n, start)
                if cache_scores:
                    cstart = pl.multiple_of(n * tile_n + start, 128)
                    cache_ref[:, pl.ds(cstart, chunk)] = s
                # Online softmax statistics.
                m_prev = m_ref[...]
                m_new = jnp.maximum(m_prev, jnp.max(s, axis=-1, keepdims=True))
                l_ref[...] = (l_ref[...] * jnp.exp(m_prev - m_new)
                              + jnp.sum(jnp.exp(s - m_new), axis=-1, keepdims=True))
                m_ref[...] = m_new

            if n_chunks == 1:
                chunk_body(0)
            else:
                pl.loop(0, n_chunks)(chunk_body)

        if cache_scores:
            # End of pass 0: convert cached logits to tau in place, so pass 1
            # never re-runs the score pipeline or the exps — it is pure memory.
            @pl.when(jnp.logical_and(p == 0, n == last_tile))
            def _():
                inv_l = pl.reciprocal(l_ref[...], approx=False)
                cache_ref[...] = jnp.exp(cache_ref[...] - m_ref[...]) * inv_l

            @pl.when(p == 1)
            def _():
                tstart = pl.multiple_of(n * tile_n, 128)
                tau = cache_ref[:, pl.ds(tstart, tile_n)]    # (1, tile_n)
                attn_ref[0] = x_ref[0] * tau
                tau_ref[0] = tau
        else:
            # Huge-N fallback (score cache would not fit VMEM): recompute the
            # now MXU-offloaded scores in pass 1.
            @pl.when(p == 1)
            def _():
                inv_l = pl.reciprocal(l_ref[...], approx=False)
                m = m_ref[...]

                def chunk_body(ci):
                    start = ci * chunk
                    if n_chunks > 1:
                        start = pl.multiple_of(start, 128)
                    xc = x_v[:, pl.ds(start, chunk)]
                    s = masked(_chunk_scores(xc, w1, b1, w2_row, ones_row), n, start)
                    tau = jnp.exp(s - m) * inv_l
                    a_v[:, pl.ds(start, chunk)] = xc * tau
                    t_v[:, pl.ds(start, chunk)] = tau

                if n_chunks == 1:
                    chunk_body(0)
                else:
                    pl.loop(0, n_chunks)(chunk_body)

    return kernel


# ---------------------------------------------------------------------------
# Wrapper.
# ---------------------------------------------------------------------------

def simple_self_attention(x_nchw, w1, b1, w2, b2=None, *,
                          tile_n=None, chunk_n=None, cache_scores=None):
    """Forward of SimpleSelfAttention.

    x_nchw: (B, C, H, W) f32.  w1: (E, C, 1, 1), b1: (E,), w2: (1, E, 1, 1),
    b2: (1,).  Returns (attended_x (B, C, H, W), tau (B, H, W)).

    b2 is accepted but unused: softmax is shift-invariant, so a scalar bias on
    the logits cannot change tau or attended_x.
    """
    del b2
    B, C, H, W = x_nchw.shape
    E = w1.shape[0]
    N = H * W

    x = x_nchw.reshape(B, C, N).astype(jnp.float32)          # flattened NCHW (free)
    w1_mat = w1.reshape(E, C).astype(jnp.float32)            # (E, C)
    b1_col = b1.reshape(E, 1).astype(jnp.float32)            # (E, 1)
    w2_row = w2.reshape(1, E).astype(jnp.float32)            # (1, E)

    vmem_limit = _vmem_limit_bytes()
    weight_specs = [
        pl.BlockSpec((E, C), lambda *_: (0, 0)),   # w1, resident across the grid
        pl.BlockSpec((E, 1), lambda *_: (0, 0)),   # b1, resident
        pl.BlockSpec((1, E), lambda *_: (0, 0)),   # w2 row, resident
    ]
    out_dtype = jnp.float32

    # ----------------------- single-pass path ------------------------------
    chunk_sp = _pick_chunk(N, chunk_n)
    if tile_n is None and _single_pass_vmem_bytes(C, E, N, chunk_sp) <= vmem_limit:
        attn, tau = pl.pallas_call(
            _make_single_pass_kernel(n=N, chunk=chunk_sp),
            out_shape=(jax.ShapeDtypeStruct((B, C, N), out_dtype),
                       jax.ShapeDtypeStruct((B, 1, N), out_dtype)),
            grid_spec=pltpu.PrefetchScalarGridSpec(
                num_scalar_prefetch=0,
                grid=(B,),
                in_specs=[pl.BlockSpec((1, C, N), lambda b: (b, 0, 0))] + weight_specs,
                out_specs=[pl.BlockSpec((1, C, N), lambda b: (b, 0, 0)),
                           pl.BlockSpec((1, 1, N), lambda b: (b, 0, 0))],
                scratch_shapes=[pltpu.VMEM((1, N), jnp.float32)],   # scores
            ),
            compiler_params=pltpu.CompilerParams(
                dimension_semantics=("parallel",),
                vmem_limit_bytes=vmem_limit),
        )(x, w1_mat, b1_col, w2_row)
        return attn.reshape(B, C, H, W), tau.reshape(B, H, W)

    # ----------------------- two-pass tiled path ---------------------------
    if tile_n is not None:
        tile = max(128, (tile_n // 128) * 128)
        n_pad = -(-N // tile) * tile
        needs_mask = n_pad != N
    else:
        tile, n_pad, needs_mask = _pick_tile(N, _two_pass_tile_lanes(C, vmem_limit))
    num_tiles = n_pad // tile
    chunk_tp = _pick_chunk(tile, chunk_n)

    if cache_scores is None:
        step_bytes = tile * 4 * (4 * C + 2)
        cache_scores = 4 * n_pad <= max(0, vmem_limit - step_bytes - (8 << 20))
    cache_lanes = n_pad if cache_scores else 128

    x_in = x if not needs_mask else jnp.pad(x, ((0, 0), (0, 0), (0, n_pad - N)))

    kernel = _make_two_pass_kernel(tile_n=tile, chunk=chunk_tp, n_true=N,
                                   cache_scores=cache_scores, needs_mask=needs_mask)
    attn, tau = pl.pallas_call(
        kernel,
        out_shape=(jax.ShapeDtypeStruct((B, C, n_pad), out_dtype),
                   jax.ShapeDtypeStruct((B, 1, n_pad), out_dtype)),
        grid_spec=pltpu.PrefetchScalarGridSpec(
            num_scalar_prefetch=0,
            grid=(B, 2, num_tiles),
            in_specs=[pl.BlockSpec((1, C, tile), lambda b, p, n: (b, 0, n))]
                     + weight_specs,
            # Outputs are written only during pass p==1.  While p==0 the index
            # map pins the output block to tile 0; Pallas only flushes an
            # output block when its block index changes, so every HBM block is
            # DMA'd out exactly once, after pass 1 has filled it.
            out_specs=[pl.BlockSpec((1, C, tile), lambda b, p, n: (b, 0, n * p)),
                       pl.BlockSpec((1, 1, tile), lambda b, p, n: (b, 0, n * p))],
            scratch_shapes=[pltpu.VMEM((1, 1), jnp.float32),        # running max
                            pltpu.VMEM((1, 1), jnp.float32),        # running sum
                            pltpu.VMEM((1, cache_lanes), jnp.float32)],  # logits/tau
        ),
        # TODO(synk): on v7x (2 TensorCores) with B < 2 the only parallel axis
        # is batch, so one core idles; split spatial tiles across cores with
        # per-core partial (m, l) stats and a small combine step.
        compiler_params=pltpu.CompilerParams(
            dimension_semantics=("parallel", "arbitrary", "arbitrary"),
            vmem_limit_bytes=vmem_limit),
    )(x_in, w1_mat, b1_col, w2_row)

    if needs_mask:
        attn = attn[:, :, :N]
        tau = tau[:, :, :N]
    return attn.reshape(B, C, H, W), tau.reshape(B, H, W)


# ---------------------------------------------------------------------------
# Reference + test.
# ---------------------------------------------------------------------------

def _reference(x_nchw, w1, b1, w2, b2):
    """Pure-JAX reference mirroring the PyTorch forward."""
    B, C, H, W = x_nchw.shape
    E = w1.shape[0]
    x = x_nchw.astype(jnp.float32)
    t = jnp.einsum('bchw,ec->behw', x, w1.reshape(E, C)) + b1.reshape(1, E, 1, 1)
    norm = jnp.sqrt(jnp.sum(t * t, axis=1, keepdims=True))
    t = t / jnp.maximum(norm, 1e-12)
    t = jnp.maximum(t, 0.0)
    s = jnp.einsum('behw,e->bhw', t, w2.reshape(E)) + b2.reshape(1, 1, 1)
    tau = jax.nn.softmax(s.reshape(B, -1), axis=1).reshape(B, H, W)
    return x * tau[:, None, :, :], tau


if __name__ == "__main__":
    B, C, E = 2, 4, 32

    key = jax.random.PRNGKey(0)
    kx, kw1, kb1, kw2, kb2, kx2 = jax.random.split(key, 6)
    w1 = 0.1 * jax.random.normal(kw1, (E, C, 1, 1), dtype=jnp.float32)
    b1 = 0.1 * jax.random.normal(kb1, (E,), dtype=jnp.float32)
    w2 = 0.1 * jax.random.normal(kw2, (1, E, 1, 1), dtype=jnp.float32)
    b2 = 0.1 * jax.random.normal(kb2, (1,), dtype=jnp.float32)

    # Main input: 16x16 -> N = 256.
    x = jax.random.normal(kx, (B, C, 16, 16), dtype=jnp.float32)
    ref_attn, ref_tau = _reference(x, w1, b1, w2, b2)

    configs = [
        dict(),                                      # single-pass, 1 chunk
        dict(chunk_n=128),                           # single-pass, chunked loop
        dict(tile_n=128),                            # two-pass cached, 2 tiles
        dict(tile_n=256, chunk_n=128),               # two-pass cached, chunked loop
        dict(tile_n=128, cache_scores=False),        # two-pass recompute fallback
    ]
    results = []
    for cfg in configs:
        results.append(simple_self_attention(x, w1, b1, w2, b2, **cfg))
    jax.block_until_ready(results)
    for attn, tau in results:
        assert jnp.allclose(attn, ref_attn, atol=1e-5, rtol=1e-5)
        assert jnp.allclose(tau, ref_tau, atol=1e-6, rtol=1e-5)

    # Odd spatial size (N = 100, no 128 divisor): padded + masked two-pass path.
    x_odd = jax.random.normal(kx2, (B, C, 10, 10), dtype=jnp.float32)
    ref_attn_o, ref_tau_o = _reference(x_odd, w1, b1, w2, b2)
    attn_o, tau_o = simple_self_attention(x_odd, w1, b1, w2, b2, tile_n=128)
    jax.block_until_ready((attn_o, tau_o))
    assert jnp.allclose(attn_o, ref_attn_o, atol=1e-5, rtol=1e-5)
    assert jnp.allclose(tau_o, ref_tau_o, atol=1e-6, rtol=1e-5)

    print("KERNEL_OK")
</pallas_src>

<mosaic_0001>
module attributes {stable_mosaic.version = 11 : i64} {
  func.func @kernel(%arg0: i32, %arg1: memref<1x4x256xf32, #tpu.memory_space<vmem>>, %arg2: memref<32x4xf32, #tpu.memory_space<vmem>>, %arg3: memref<32x1xf32, #tpu.memory_space<vmem>>, %arg4: memref<1x32xf32, #tpu.memory_space<vmem>>, %arg5: memref<1x4x256xf32, #tpu.memory_space<vmem>>, %arg6: memref<1x1x256xf32, #tpu.memory_space<vmem>>, %arg7: memref<1x256xf32, #tpu.memory_space<vmem>>) attributes {dimension_semantics = [#tpu.dimension_semantics<parallel>], iteration_bounds = array<i64: 2>, scalar_prefetch = 0 : i64, scratch_operands = 1 : i64, tpu.core_type = #tpu.core_type<tc>, window_params = [{transform_indices = @transform_0, window_bounds = array<i64: 1, 4, 256>}, {pipeline_mode = #tpu.pipeline_mode<synchronous>, transform_indices = @transform_1, window_bounds = array<i64: 32, 4>}, {pipeline_mode = #tpu.pipeline_mode<synchronous>, transform_indices = @transform_2, window_bounds = array<i64: 32, 1>}, {pipeline_mode = #tpu.pipeline_mode<synchronous>, transform_indices = @transform_3, window_bounds = array<i64: 1, 32>}, {transform_indices = @transform_4, window_bounds = array<i64: 1, 4, 256>}, {transform_indices = @transform_5, window_bounds = array<i64: 1, 1, 256>}]} {
    %c0 = arith.constant 0 : index
    %c0_0 = arith.constant 0 : index
    %0 = vector.load %arg2[%c0, %c0_0] : memref<32x4xf32, #tpu.memory_space<vmem>>, vector<32x4xf32>
    %c0_1 = arith.constant 0 : index
    %c0_2 = arith.constant 0 : index
    %1 = vector.load %arg3[%c0_1, %c0_2] : memref<32x1xf32, #tpu.memory_space<vmem>>, vector<32x1xf32>
    %c0_3 = arith.constant 0 : index
    %c0_4 = arith.constant 0 : index
    %2 = vector.load %arg4[%c0_3, %c0_4] : memref<1x32xf32, #tpu.memory_space<vmem>>, vector<1x32xf32>
    %cst = arith.constant 1.000000e+00 : f32
    %3 = vector.broadcast %cst : f32 to vector<1x32xf32>
    %c0_i32 = arith.constant 0 : i32
    %c0_i32_5 = arith.constant 0 : i32
    %c0_i32_6 = arith.constant 0 : i32
    %4 = tpu.memref_slice %arg1[%c0_i32, %c0_i32_5, %c0_i32_6] : memref<1x4x256xf32, #tpu.memory_space<vmem>> -> memref<1x4x256xf32, #tpu.memory_space<vmem>>
    %5 = tpu.memref_squeeze %4 : memref<1x4x256xf32, #tpu.memory_space<vmem>> -> memref<4x256xf32, #tpu.memory_space<vmem>>
    %c0_7 = arith.constant 0 : index
    %c0_8 = arith.constant 0 : index
    %6 = vector.load %5[%c0_7, %c0_8] : memref<4x256xf32, #tpu.memory_space<vmem>>, vector<4x256xf32>
    %cst_9 = arith.constant dense<0.000000e+00> : vector<32x256xf32>
    %7 = tpu.matmul %0, %6, %cst_9 {dimension_numbers = #tpu.dot_dimension_numbers<[1], [0], [0], [1], [0, 0, 1, 1], [], []>} : vector<32x4xf32>, vector<4x256xf32>, vector<32x256xf32> -> vector<32x256xf32>
    %8 = vector.broadcast %1 : vector<32x1xf32> to vector<32x256xf32>
    %9 = arith.addf %7, %8 : vector<32x256xf32>
    %cst_10 = arith.constant 0.000000e+00 : f32
    %10 = vector.broadcast %cst_10 : f32 to vector<32x256xf32>
    %11 = arith.maximumf %9, %10 : vector<32x256xf32>
    %cst_11 = arith.constant dense<0.000000e+00> : vector<1x256xf32>
    %12 = tpu.matmul %2, %11, %cst_11 {dimension_numbers = #tpu.dot_dimension_numbers<[1], [0], [0], [1], [0, 0, 1, 1], [], []>} : vector<1x32xf32>, vector<32x256xf32>, vector<1x256xf32> -> vector<1x256xf32>
    %13 = arith.mulf %9, %9 : vector<32x256xf32>
    %cst_12 = arith.constant dense<0.000000e+00> : vector<1x256xf32>
    %14 = tpu.matmul %3, %13, %cst_12 {dimension_numbers = #tpu.dot_dimension_numbers<[1], [0], [0], [1], [0, 0, 1, 1], [], []>} : vector<1x32xf32>, vector<32x256xf32>, vector<1x256xf32> -> vector<1x256xf32>
    %cst_13 = arith.constant 1.000000e-24 : f32
    %15 = vector.broadcast %cst_13 : f32 to vector<1x256xf32>
    %16 = arith.maximumf %14, %15 : vector<1x256xf32>
    %17 = math.rsqrt %16 : vector<1x256xf32>
    %18 = arith.mulf %12, %17 : vector<1x256xf32>
    %c0_14 = arith.constant 0 : index
    %c0_15 = arith.constant 0 : index
    %19 = vector.load %arg7[%c0_14, %c0_15] : memref<1x256xf32, #tpu.memory_space<vmem>>, vector<1x256xf32>
    tpu.vector_store %arg7[%c0_14, %c0_15], %18 {strides = array<i32>} : memref<1x256xf32, #tpu.memory_space<vmem>>, vector<1x256xf32>,
    %c0_16 = arith.constant 0 : index
    %c0_17 = arith.constant 0 : index
    %20 = vector.load %arg7[%c0_16, %c0_17] : memref<1x256xf32, #tpu.memory_space<vmem>>, vector<1x256xf32>
    %cst_18 = arith.constant dense<0xFF800000> : vector<1xf32>
    %21 = vector.multi_reduction <maximumf>, %20, %cst_18 [1] : vector<1x256xf32> to vector<1xf32>
    %22 = vector.shape_cast %21 : vector<1xf32> to vector<1x1xf32>
    %23 = vector.broadcast %22 : vector<1x1xf32> to vector<1x256xf32>
    %24 = arith.subf %20, %23 : vector<1x256xf32>
    %25 = math.exp %24 : vector<1x256xf32>
    %cst_19 = arith.constant dense<0.000000e+00> : vector<1xf32>
    %26 = vector.multi_reduction <add>, %25, %cst_19 [1] : vector<1x256xf32> to vector<1xf32>
    %27 = vector.shape_cast %26 : vector<1xf32> to vector<1x1xf32>
    %28 = tpu.reciprocal %27 : vector<1x1xf32> -> vector<1x1xf32>
    %29 = vector.broadcast %28 : vector<1x1xf32> to vector<1x256xf32>
    %30 = arith.mulf %25, %29 : vector<1x256xf32>
    %c0_20 = arith.constant 0 : index
    %c0_21 = arith.constant 0 : index
    %c0_22 = arith.constant 0 : index
    %31 = vector.load %arg1[%c0_20, %c0_21, %c0_22] : memref<1x4x256xf32, #tpu.memory_space<vmem>>, vector<1x4x256xf32>
    %32 = vector.shape_cast %31 : vector<1x4x256xf32> to vector<4x256xf32>
    %33 = vector.broadcast %30 : vector<1x256xf32> to vector<4x256xf32>
    %34 = arith.mulf %32, %33 : vector<4x256xf32>
    %c0_23 = arith.constant 0 : index
    %c0_24 = arith.constant 0 : index
    %c0_25 = arith.constant 0 : index
    %35 = vector.load %arg5[%c0_23, %c0_24, %c0_25] : memref<1x4x256xf32, #tpu.memory_space<vmem>>, vector<1x4x256xf32>
    %36 = vector.shape_cast %35 : vector<1x4x256xf32> to vector<4x256xf32>
    %37 = vector.shape_cast %34 : vector<4x256xf32> to vector<1x4x256xf32>
    tpu.vector_store %arg5[%c0_23, %c0_24, %c0_25], %37 {strides = array<i32>} : memref<1x4x256xf32, #tpu.memory_space<vmem>>, vector<1x4x256xf32>,
    %c0_26 = arith.constant 0 : index
    %c0_27 = arith.constant 0 : index
    %c0_28 = arith.constant 0 : index
    %38 = vector.load %arg6[%c0_26, %c0_27, %c0_28] : memref<1x1x256xf32, #tpu.memory_space<vmem>>, vector<1x1x256xf32>
    %39 = vector.shape_cast %38 : vector<1x1x256xf32> to vector<1x256xf32>
    %40 = vector.shape_cast %30 : vector<1x256xf32> to vector<1x1x256xf32>
    tpu.vector_store %arg6[%c0_26, %c0_27, %c0_28], %40 {strides = array<i32>} : memref<1x1x256xf32, #tpu.memory_space<vmem>>, vector<1x1x256xf32>,
    return
  }
  func.func @transform_0(%arg0: i32) -> (i32, i32, i32) {
    %c0_i32 = arith.constant 0 : i32
    %c0_i32_0 = arith.constant 0 : i32
    %c0_i32_1 = arith.constant 0 : i32
    return %arg0, %c0_i32, %c0_i32_0 : i32, i32, i32
  }
  func.func @transform_1(%arg0: i32) -> (i32, i32) {
    %c0_i32 = arith.constant 0 : i32
    %c0_i32_0 = arith.constant 0 : i32
    %c0_i32_1 = arith.constant 0 : i32
    return %c0_i32, %c0_i32_0 : i32, i32
  }
  func.func @transform_2(%arg0: i32) -> (i32, i32) {
    %c0_i32 = arith.constant 0 : i32
    %c0_i32_0 = arith.constant 0 : i32
    %c0_i32_1 = arith.constant 0 : i32
    return %c0_i32, %c0_i32_0 : i32, i32
  }
  func.func @transform_3(%arg0: i32) -> (i32, i32) {
    %c0_i32 = arith.constant 0 : i32
    %c0_i32_0 = arith.constant 0 : i32
    %c0_i32_1 = arith.constant 0 : i32
    return %c0_i32, %c0_i32_0 : i32, i32
  }
  func.func @transform_4(%arg0: i32) -> (i32, i32, i32) {
    %c0_i32 = arith.constant 0 : i32
    %c0_i32_0 = arith.constant 0 : i32
    %c0_i32_1 = arith.constant 0 : i32
    return %arg0, %c0_i32, %c0_i32_0 : i32, i32, i32
  }
  func.func @transform_5(%arg0: i32) -> (i32, i32, i32) {
    %c0_i32 = arith.constant 0 : i32
    %c0_i32_0 = arith.constant 0 : i32
    %c0_i32_1 = arith.constant 0 : i32
    return %arg0, %c0_i32, %c0_i32_0 : i32, i32, i32
  }
}

</mosaic_0001>

<bundles_post_ra>
// kernel: tpu_custom_call.1
= control target key start
LH: loop header
LB: loop body
LE: loop exit
PB: predicated region body
PF: predicated region fallthrough
CT: control target
= control target key end

     0   :  { %11 = vsyncpa [#allocation4], 0  ;;  %s1036_s0 = inlined_call_operand.vmem [shape: f32[2,4,256], index: 0, kind: input, shape index: {}]   ;;  %s1037_s1 = inlined_call_operand.vmem [shape: f32[32,4], index: 1, kind: input, shape index: {}]   ;;  %s1038_s2 = inlined_call_operand.vmem [shape: f32[32,1], index: 2, kind: input, shape index: {}]   ;;  %s1039_s3 = inlined_call_operand.vmem [shape: f32[1,32], index: 3, kind: input, shape index: {}]   ;;  %s1040_s4 = inlined_call_operand.hbm [shape: f32[2,4,256], index: 4, kind: output, shape index: {0}]   ;;  %s1041_s5 = inlined_call_operand.hbm [shape: f32[2,1,256], index: 5, kind: output, shape index: {1}]  }
   0x1   :  { %13 = vsyncpa [#allocation4 + $0x1], 0 }
   0x2   :  { %14 = vsyncpa [#allocation6], 0 }
   0x3   :  { %16 = vsyncpa [#allocation6 + $0x1], 0  ;;  %s880_s18 = smov 0   ;;  %s882_s19 = smov 0  }
   0x4   :  { %s884_s20 = smov 0   ;;  %s886_s21 = smov 0  }
   0x5 LB: > { %s901_s22 = sadd.s32 4294967295, %s846_s21   ;;  %s665_s23 = sadd.s32 4294967294, %s846_s21   ;;  %s846_s21 = sphi %s886_s21, %s1049_s21   ;;  %s842_s20 = sphi %s884_s20, %s1048_s20   ;;  %s838_s19 = sphi %s882_s19, %s1047_s19   ;;  %s834_s18 = sphi %s880_s18, %s1046_s18  }
   0x6   : > { %s905_s24 = sadd.s32 1, %s846_s21   ;;  %s118_s25 = sadd.s32 1, %s842_s20 }
   0x7   : > { %s115_s26 = ssub.s32 %s846_s21, %s905_s24  ;;  %p128_p0 = scmp.ne.s32.totalorder %s842_s20, %s838_s19 }
   0x8   : > { %p116_p1 = scmp.eq.s32.totalorder %s115_s26, 0  ;;  %p129_p2 = scmp.eq.s32.totalorder %s901_s22, 1 }
   0x9   : > { %p134_p3 = scmp.ne.s32.totalorder %s838_s19, %s834_s18  ;;  %p135_p4 = scmp.eq.s32.totalorder %s665_s23, 1 }
   0xa   : > { %s916_s27 = scalar_select %p116_p1, %s842_s20, %s118_s25  }
   0xb   : > { %p918_p5 = por %p129_p2, %p128_p0  ;;  %p922_p6 = por %p135_p4, %p134_p3 }
   0xc   : > { %p668_p7 = scmp.ge.s32.totalorder %s846_s21, 1  ;;  %p196_p8 = scmp.lt.s32.totalorder %s846_s21, 3 }
   0xe   : > { %p197_p9 = pnand %p668_p7, %p196_p8 }
   0xf   : > { %p229_p10 = scmp.lt.s32.totalorder (!%p197_p9), %s901_s22, 1  ;;  %s981_s12 = sand.u32 (!%p197_p9), 1, %s838_s19  }
  0x10   : > { %200 = sbr.rel (%p197_p9) target bundleno = 663 (0x297), region = 36  ;;  %s670_s14 = sshll.u32 (!%p197_p9), %s981_s12, 1 }
  0x11   : > { %s228_s23 = scalar_lea.vmem (!%p197_p9), [#allocation5], %s670_s14  ;;  %s669_s30 = sshll.u32 (!%p197_p9), %s981_s12, 3 }
  0x12   : > { %s570_s25 = sshll.u32 (!%p197_p9), %s228_s23, 4  ;;  %s695_s6 = sshll.u32 (!%p197_p9), %s901_s22, 3  ;;  %s571_s25 = int_to_ptr.vmem [resolvable:$true] %s570_s25 }
  0x13   : > { %s554_s9 = scalar_lea.hbm (!%p197_p9), %s1040_s4, %s695_s6  ;;  %s772_s15 = scalar_lea.hbm (!%p197_p9), %s1041_s5, 4 }
  0x15   : > { %v239_v0 = vld [vmem:[%s1038_s2 + $0x8] sm:$0xff]  ;;  %v848_v1 = vmov 0   ;;  %s230_s7 = scalar_select %p229_p10, %s901_s22, 1  ;;  %v241_v2 = vld [vmem:[%s1038_s2 + $0x18] sm:$0xff]  ;;  %v238_v4 = vld [vmem:[%s1038_s2] sm:$0xff]  ;;  %vm281_vm0 = vcmask 1043456  }
  0x16   : > { %743 = vset.pattern.permute.xlu1 %v848_v1  ;;  %742 = vset.pattern.permute.xlu0 %v848_v1  ;;  %v240_v5 = vld [vmem:[%s1038_s2 + $0x10] sm:$0xff]  ;;  %v234_v6 = vld [vmem:[%s1037_s1] sm:$0xff]  ;;  %vm268_vm1 = vcmask 31744   ;;  %v235_v9 = vld [vmem:[%s1037_s1 + $0x8] sm:$0xff]  ;;  %vm352_vm2 = vcmask 261120   ;;  %v849_v49 = vmov 1.0  }
  0x17   : > { %251 = vperm.xlu1 %743, %v239_v0   ;;  %261 = vperm.xlu0 %742, %v241_v2   ;;  %s694_s10 = sshll.u32 %s230_s7, 3  ;;  %v236_v10 = vld [vmem:[%s1037_s1 + $0x10] sm:$0xff]  ;;  %v237_v11 = vld [vmem:[%s1037_s1 + $0x18] sm:$0xff]  ;;  %v242_v40 = vld [vmem:[%s1039_s3] sm:$0x1]  ;;  %vm474_vm9 = vcmask 1040384  }
  0x18   : > { %s233_s13 = scalar_lea.vmem %s1036_s0, %s694_s10  ;;  %s543_s10 = scalar_lea.sflag [#allocation6], %s981_s12 }
  0x19   : > { %v939_v3 = vld [vmem:[%s233_s13] sm:$0xff]  ;;  %s691_s13 = sshll.u32 %s901_s22, 1 }
  0x1a   : > { %265 = vst [vmem:[#allocation1] ss:$2 sm:$0xff] %v939_v3  ;;  %s568_s17 = scalar_lea.hbm %s1041_s5, %s691_s13 }
  0x1b   : > { %s572_s26 = sshll.u32 %s568_s17, 4  ;;  %s573_s26 = int_to_ptr.hbm [resolvable:$true] %s572_s26 }
  0x1c   : > { %s766_s11 = sshra.s32 %s573_s26, 4  ;;  %s767_s11 = int_to_ptr.hbm [resolvable:$true] %s766_s11 }
  0x1d   : > { %s768_s13 = scalar_lea.hbm %s767_s11, 2  ;;  %p773_p0 = scmp.lt.s32.totalorder %s767_s11, %s1041_s5 }
  0x1e   : > { %p769_p11 = scmp.ne.s32.totalorder %s767_s11, %s768_s13  ;;  %p774_p1 = scmp.lt.s32.totalorder %s772_s15, %s768_s13 }
  0x1f   : > { %246 = vperm.xlu1 %743, %v238_v4   ;;  %256 = vperm.xlu0 %742, %v240_v5   ;;  %v477_v5 = vlaneseq }
  0x20   : > { %p770_p12 = pnand %p769_p11, %p918_p5  ;;  %p775_p2 = por %p774_p1, %p773_p0 }
  0x21   : > { %v266_v7 = vld.sshfl [vmem:[#allocation1] sm:$0xff pattern:$0x75316420]  ;;  %v267_v8 = vld.sshfl [vmem:[#allocation1 + $0x8] sm:$0xff pattern:$0x75316420] }
  0x22   : > { %673 = vmatpush.msk.msra.mxu0 %vm281_vm0, %v266_v7  ;;  %678 = vmatpush.msk.msra.mxu1 %vm281_vm0, %v267_v8  ;;  %vm969_vm10 = vcmp.lt.s32.totalorder %v477_v5, 256  ;;  %p771_p13 = pneg %p770_p12 }
  0x23   : > { %674 = vmatmul.msk.f32.vlgmr.msra.gmra.mxu0 %vm268_vm1, %v234_v6  ;;  %679 = vmatmul.msk.f32.vlgmr.msra.gmra.mxu1 %vm268_vm1, %v234_v6 }
  0x24   : > { %p776_p3 = pnand %p775_p2, %p771_p13 }
  0x2b   : > { %675 = vmatmul.msk.f32.gmra.mxu0 %vm268_vm1, %v235_v9  ;;  %680 = vmatmul.msk.f32.gmra.mxu1 %vm268_vm1, %v235_v9 }
  0x33   : > { %676 = vmatmul.msk.f32.gmra.mxu0 %vm268_vm1, %v236_v10  ;;  %681 = vmatmul.msk.f32.gmra.mxu1 %vm268_vm1, %v236_v10 }
  0x3b   : > { %677 = vmatmul.msk.f32.gmra.mxu0 %vm268_vm1, %v237_v11  ;;  %682 = vmatmul.msk.f32.gmra.mxu1 %vm268_vm1, %v237_v11 }
  0x89   : > { %v262_v16 = vpop.permute.xlu0 %261  ;;  %v252_v17 = vpop.permute.xlu1 %251 }
  0x91   : > { %v257_v20 = vpop.permute.xlu0 %256  ;;  %v247_v27 = vpop.permute.xlu1 %246 }
  0xa0   : > { %v303_v12 = vpop.f32.mrf.mxu0  ;;  %v332_v13 = vpop.f32.mrf.mxu1 }
  0xa1   : > { %v304_v32 = vadd.f32 %v303_v12, %v247_v27  ;;  %v333_v33 = vadd.f32 %v332_v13, %v247_v27 }
  0xa3   : > { %v344_v38 = vmax.f32 %v304_v32, 0.0  ;;  %v345_v39 = vmax.f32 %v333_v33, 0.0  ;;  %v396_v47 = vmul.f32 %v304_v32, %v304_v32  ;;  %v397_v48 = vmul.f32 %v333_v33, %v333_v33 }
  0xa8   : > { %v306_v14 = vpop.f32.mrf.mxu0  ;;  %v335_v15 = vpop.f32.mrf.mxu1 }
  0xa9   : > { %v307_v28 = vadd.f32 %v306_v14, %v252_v17  ;;  %v336_v29 = vadd.f32 %v335_v15, %v252_v17 }
  0xab   : > { %v346_v36 = vmax.f32 %v307_v28, 0.0  ;;  %v347_v37 = vmax.f32 %v336_v29, 0.0  ;;  %v398_v45 = vmul.f32 %v307_v28, %v307_v28  ;;  %v399_v46 = vmul.f32 %v336_v29, %v336_v29 }
  0xb0   : > { %v309_v18 = vpop.f32.mrf.mxu0  ;;  %v338_v19 = vpop.f32.mrf.mxu1 }
  0xb1   : > { %v310_v23 = vadd.f32 %v309_v18, %v257_v20  ;;  %v339_v24 = vadd.f32 %v338_v19, %v257_v20 }
  0xb3   : > { %v348_v34 = vmax.f32 %v310_v23, 0.0  ;;  %v349_v35 = vmax.f32 %v339_v24, 0.0  ;;  %v400_v43 = vmul.f32 %v310_v23, %v310_v23  ;;  %v401_v44 = vmul.f32 %v339_v24, %v339_v24 }
  0xb8   : > { %v312_v21 = vpop.f32.mrf.mxu0  ;;  %v341_v22 = vpop.f32.mrf.mxu1 }
  0xb9   : > { %v313_v25 = vadd.f32 %v312_v21, %v262_v16  ;;  %v342_v26 = vadd.f32 %v341_v22, %v262_v16 }
  0xbb   : > { %v350_v30 = vmax.f32 %v313_v25, 0.0  ;;  %v351_v31 = vmax.f32 %v342_v26, 0.0  ;;  %v402_v41 = vmul.f32 %v313_v25, %v313_v25  ;;  %v403_v42 = vmul.f32 %v342_v26, %v342_v26 }
  0xbd   : > { %368 = vmatpush.msra.mxu2 %v350_v30  ;;  %388 = vmatpush.msra.mxu3 %v351_v31 }
  0xbf   : > { %369 = vmatpush.msra.mxu2 %v348_v34  ;;  %389 = vmatpush.msra.mxu3 %v349_v35 }
  0xc1   : > { %370 = vmatpush.msra.mxu2 %v346_v36  ;;  %390 = vmatpush.msra.mxu3 %v347_v37 }
  0xc3   : > { %371 = vmatpush.msra.mxu2 %v344_v38  ;;  %391 = vmatpush.msra.mxu3 %v345_v39 }
  0xc4   : > { %683 = vmatmul.msk.f32.vlgmr.msra.gmra.mxu2 %vm352_vm2, %v242_v40  ;;  %684 = vmatmul.msk.f32.vlgmr.msra.gmra.mxu3 %vm352_vm2, %v242_v40 }
  0xc5   : > { %419 = vmatpush.msrb.mxu2 %v402_v41  ;;  %439 = vmatpush.msrb.mxu3 %v403_v42 }
  0xc7   : > { %420 = vmatpush.msrb.mxu2 %v400_v43  ;;  %440 = vmatpush.msrb.mxu3 %v401_v44 }
  0xc9   : > { %421 = vmatpush.msrb.mxu2 %v398_v45  ;;  %441 = vmatpush.msrb.mxu3 %v399_v46 }
  0xcb   : > { %422 = vmatpush.msrb.mxu2 %v396_v47  ;;  %442 = vmatpush.msrb.mxu3 %v397_v48 }
  0xcc   : > { %685 = vmatmul.msk.f32.vlgmr.msrb.gmra.mxu2 %vm352_vm2, %v849_v49  ;;  %686 = vmatmul.msk.f32.vlgmr.msrb.gmra.mxu3 %vm352_vm2, %v849_v49 }
 0x147   : > { %v373_v50 = vpop.f32.mrf.mxu2  ;;  %v393_v51 = vpop.f32.mrf.mxu3 }
 0x14f   : > { %v424_v52 = vpop.f32.mrf.mxu2  ;;  %v444_v53 = vpop.f32.mrf.mxu3 }
 0x150   : > { %v447_v54 = vmax.f32 %v424_v52, 1e-24  ;;  %v448_v55 = vmax.f32 %v444_v53, 1e-24 }
 0x152   : > { %744 = vrsqrt.f32 %v447_v54  ;;  %vm455_vm5 = vweird.f32 %v447_v54  ;;  %vm465_vm7 = vweird.f32 %v448_v55 }
 0x153   : > { %746 = vrsqrt.f32 %v448_v55 }
 0x158   : > { %v745_v56 = vpop.eup %744 }
 0x159   : > { %v747_v57 = vpop.eup %746  ;;  %v450_v58 = vmul.f32 %v745_v56, %v447_v54  ;;  %vm456_vm3 = vweird.f32 %v745_v56 }
 0x15a   : > { %v460_v59 = vmul.f32 %v747_v57, %v448_v55  ;;  %vm466_vm4 = vweird.f32 %v747_v57  ;;  %vm457_vm6 = vmor %vm455_vm5, %vm456_vm3 }
 0x15b   : > { %v451_v60 = vmul.f32 %v745_v56, %v450_v58  ;;  %vm467_vm8 = vmor %vm465_vm7, %vm466_vm4 }
 0x15c   : > { %v461_v61 = vmul.f32 %v747_v57, %v460_v59 }
 0x15d   : > { %v452_v62 = vmul.f32 0.5, %v451_v60 }
 0x15e   : > { %v462_v63 = vmul.f32 0.5, %v461_v61 }
 0x15f   : > { %v453_v0 = vsub.f32 1.5, %v452_v62 }
 0x160   : > { %v463_v1 = vsub.f32 1.5, %v462_v63 }
 0x161   : > { %v454_v2 = vmul.f32 %v745_v56, %v453_v0 }
 0x162   : > { %v464_v4 = vmul.f32 %v747_v57, %v463_v1 }
 0x163   : > { %v458_v6 = vsel %vm457_vm6, %v745_v56, %v454_v2 }
 0x164   : > { %v468_v7 = vsel %vm467_vm8, %v747_v57, %v464_v4  ;;  %v469_v9 = vmul.f32 %v458_v6, %v373_v50 }
 0x165   : > { %v470_v8 = vmul.f32 %v468_v7, %v393_v51 }
 0x167   : > { %v473_v10 = vrot.slane %v470_v8, 7 }
 0x169   : > { %v475_v12 = vsel %vm474_vm9, %v469_v9, %v473_v10 }
 0x16a   : > { %481 = vst.msk [vmem:[#allocation2] sm:$0x3] %vm969_vm10, %v475_v12 }
 0x171   : > { %v482_v13 = vld [vmem:[#allocation2] sm:$0x3] }
 0x172   : > { %v484_v14 = vperm.slane %v482_v13, 0  ;;  %v485_v15 = vperm.slane %v482_v13, 1 }
 0x174   : > { %v488_v16 = vsel %vm474_vm9, %v484_v14, -inf  ;;  %v489_v17 = vsel %vm474_vm9, %v485_v15, -inf }
 0x175   : > { %v490_v18 = vmax.f32 %v488_v16, %v489_v17 }
 0x177   : > { %491 = vmax.xlane.f32.xlu2 %v490_v18 }
 0x1ea   : > { %v492_v19 = vpop.xlane.xlu2 %491 }
 0x1eb   : > { %v494_v20 = vperm.slane %v492_v19, 0 }
 0x1ed   : > { %v496_v21 = vsub.f32 %v482_v13, %v494_v20 }
 0x1ef   : > { %v497_v22 = vmul.f32 1.442695, %v496_v21 }
 0x1f1   : > { %748 = vpow2.f32 %v497_v22 }
 0x1f7   : > { %v749_v23 = vpop.eup %748 }
 0x1f8   : > { %v500_v24 = vperm.slane %v749_v23, 0  ;;  %v501_v25 = vperm.slane %v749_v23, 1 }
 0x1fa   : > { %v504_v26 = vsel %vm474_vm9, %v500_v24, 0.0  ;;  %v505_v27 = vsel %vm474_vm9, %v501_v25, 0.0 }
 0x1fb   : > { %v506_v28 = vadd.f32 %v505_v27, %v504_v26 }
 0x1fd   : > { %507 = vadd.xlane.f32.xlu2 %v506_v28 }
 0x270   : > { %v508_v29 = vpop.xlane.xlu2 %507 }
 0x271   : > { %750 = vrcp.f32 %v508_v29  ;;  %v520_v33 = vand.u32 2147483648, %v508_v29  ;;  %v518_v35 = vand.u32 2147483647, %v508_v29  ;;  %vm514_vm12 = vweird.f32 %v508_v29 }
 0x273   : > { %v521_v37 = vor.u32 1.1754944e-38, %v520_v33  ;;  %vm519_vm14 = vcmp.eq.f32.partialorder %v518_v35, 8.507059e+37 }
 0x277   : > { %v751_v30 = vpop.eup %750 }
 0x278   : > { %v510_v31 = vmul.f32 %v751_v30, %v508_v29  ;;  %vm515_vm11 = vweird.f32 %v751_v30 }
 0x279   : > { %vm516_vm13 = vmor %vm514_vm12, %vm515_vm11 }
 0x27a   : > { %v511_v32 = vsub.f32 1.0, %v510_v31 }
 0x27c   : > { %v512_v34 = vmul.f32 %v751_v30, %v511_v32 }
 0x27e   : > { %v513_v36 = vadd.f32 %v751_v30, %v512_v34 }
 0x280   : > { %v517_v38 = vsel %vm516_vm13, %v751_v30, %v513_v36 }
 0x281   : > { %v522_v39 = vsel %vm519_vm14, %v521_v37, %v517_v38 }
 0x282   : > { %v524_v40 = vperm.slane %v522_v39, 0 }
 0x284   : > { %v526_v41 = vmul.f32 %v749_v23, %v524_v40 }
 0x286   : > { %v530_v42 = vperm.slane %v526_v41, 1  ;;  %536 = vst.msk [vmem:[%s228_s23] sm:$0x3] %vm969_vm10, %v526_v41 }
 0x287   : > { %779 = shalt.err (!%p776_p3)
}
 0x288   : > { %697 = dma.vmem_to_hbm [thread:$0]  (%p918_p5), %s571_s25, 32, %s573_s26, %s543_s10   ;;  %v529_v43 = vperm.slane %v526_v41, 0  ;;  %v531_v44 = vrot.slane %v530_v42, 4 }
 0x289   : > { %s221_s23 = scalar_lea.vmem [#allocation3], %s669_s30  ;;  %s558_s7 = sshll.u32 %s554_s9, 4  ;;  %s559_s7 = int_to_ptr.hbm [resolvable:$true] %s558_s7 }
 0x28a   : > { %s556_s6 = sshll.u32 %s221_s23, 4  ;;  %v532_v45 = vsel %vm281_vm0, %v529_v43, %v531_v44  ;;  %s538_s8 = scalar_lea.sflag [#allocation4], %s981_s12  ;;  %s557_s6 = int_to_ptr.vmem [resolvable:$true] %s556_s6 }
 0x28b   : > { %v534_v46 = vmul.f32 %v532_v45, %v939_v3  ;;  %s794_s11 = sshra.s32 %s559_s7, 4  ;;  %s800_s30 = scalar_lea.hbm %s1040_s4, 16  ;;  %s795_s11 = int_to_ptr.hbm [resolvable:$true] %s794_s11 }
 0x28c   : > { %s796_s13 = scalar_lea.hbm %s795_s11, 8  ;;  %p801_p9 = scmp.lt.s32.totalorder %s795_s11, %s1040_s4 }
 0x28d   : > { %535 = vst [vmem:[%s221_s23] sm:$0xff] %v534_v46  ;;  %p797_p4 = scmp.ne.s32.totalorder %s795_s11, %s796_s13  ;;  %p802_p10 = scmp.lt.s32.totalorder %s800_s30, %s796_s13 }
 0x28f   : > { %p798_p7 = pnand %p797_p4, %p918_p5  ;;  %p803_p11 = por %p802_p10, %p801_p9 }
 0x291   : > { %p799_p8 = pneg %p798_p7 }
 0x293   : > { %p804_p12 = pnand %p803_p11, %p799_p8 }
 0x295   : > { %807 = shalt.err (!%p804_p12)
}
 0x296   : > { %696 = dma.vmem_to_hbm [thread:$0]  (%p918_p5), %s557_s6, 128, %s559_s7, %s538_s8  }
 0x297 PF: > { %p707_p13 = scmp.ge.s32.totalorder %s846_s21, 2  ;;  %s584_s12 = sand.u32 1, %s834_s18  }
 0x298   : > { %s585_s22 = scalar_lea.sflag [#allocation4], %s584_s12 }
 0x299   : > { %p701_p0 = pnand %p707_p13, %p922_p6 }
 0x29b   : > { %p702_p1 = pneg %p701_p0 }
 0x29d   : > { %825 = dma.done.wait (%p702_p1), %s585_s22, 128  }
 0x29e   : > { %827 = vsyncadd (%p702_p1), %s585_s22, 4294967168  ;;  %s595_s14 = scalar_lea.sflag [#allocation6], %s584_s12 }
 0x29f   : > { %829 = dma.done.wait (%p702_p1), %s595_s14, 32  }
 0x2a0   : > { %831 = vsyncadd (%p702_p1), %s595_s14, 4294967264  ;;  %p19_p5 = scmp.ge.s32.totalorder %s905_s24, 4   ;;  %s1046_s18 = smov %s838_s19 }
 0x2a1   : > { %s1047_s19 = smov %s842_s20  ;;  %s1048_s20 = smov %s916_s27 }
 0x2a2   : > { %s1049_s21 = smov %s905_s24  ;;  %21 = sbr.rel (!%p19_p5) target bundleno = 5 (0x5), region = 88 }
 0x2a7   :  { %601 = vsyncpa [#allocation4], 1 }
 0x2a8   :  { %603 = vsyncpa [#allocation4 + $0x1], 1 }
 0x2a9   :  { %604 = vsyncpa [#allocation6], 1 }
 0x2aa   :  { %606 = vsyncpa [#allocation6 + $0x1], 1 }

</bundles_post_ra>
